<compile_context>
chip_gen: v7x
topology: tpu7x:2x2x1
jax: 0.10.0
libtpu: 0.0.40
codegen_flags: <defaults>
</compile_context>

<pallas_src>
import random as pyrandom

import jax
import jax.numpy as jnp
from jax import lax
from jax.experimental import pallas as pl
from jax.experimental.pallas import tpu as pltpu

NUM_ITEMS = 100
MASK_TOKEN = NUM_ITEMS + 1      # mask token id used by Item_Mask
GAMMA = 0.3                     # Item_Mask masking probability
ETA = 0.6                       # Item_Crop keep-ratio
BETA = 0.3                      # Item_Reorder window ratio

_MASK_THRESH_U32 = int(GAMMA * (1 << 32))   # integer threshold for uint32 uniform


def _round_up(x, m):
    return ((x + m - 1) // m) * m


def _aug_kernel(seq_ref, params_ref, rand_ref, out_ref):
    """Apply the per-sample augmentation chosen on the host.

    seq_ref    : VMEM (TB, Lp) int32   -- item-id sequences (0 = pad)
    params_ref : VMEM (TB, 8)  int32   -- [method, start, plen, seq_len, 0,0,0,0]
    rand_ref   : VMEM (TB, Lp) uint32  -- per-token uniform random bits
    out_ref    : VMEM (TB, Lp) int32   -- augmented sequences (0 = pad)
    """
    TB, L = seq_ref.shape
    seq = seq_ref[...]                       # (TB, Lp) int32
    params = params_ref[...]                 # (TB, 8)  int32
    method = params[:, 0:1]                  # (TB, 1)
    start = params[:, 1:2]                   # crop / reorder window start
    plen = params[:, 2:3]                    # crop / reorder window length
    slen = params[:, 3:4]                    # original seq_len

    j = lax.broadcasted_iota(jnp.int32, (TB, L), 1)

    # --- source index per augmentation method -------------------------------
    crop_src = start + j                                   # shift window to front
    reorder_src = 2 * start + plen - 1 - j                 # reverse inside window
    in_seg = (j >= start) & (j < start + plen)
    src = jnp.where(method == 0, crop_src,
                    jnp.where((method == 2) & in_seg, reorder_src, j))
    src = jnp.clip(src, 0, L - 1)

    # --- int32 lane gather (no one-hot, no float round-trip) -----------------
    gathered = jnp.take_along_axis(seq, src, axis=-1)      # (TB, Lp) int32

    # --- random item masking (method == 1), pure integer threshold -----------
    bits = rand_ref[...]                                   # (TB, Lp) uint32
    do_mask = (method == 1) & (bits < jnp.uint32(_MASK_THRESH_U32)) & (j < slen)
    out = jnp.where(do_mask, jnp.int32(MASK_TOKEN), gathered)

    # --- zero-pad beyond the new sequence length (pad_sequence semantics) ----
    new_len = jnp.where(method == 0, plen, slen)
    out_ref[...] = jnp.where(j < new_len, out, jnp.int32(0))


def _pallas_augment(sequences, params, rand_bits, *, tb=8):
    """Batch-tiled, lane-dense pallas_call around _aug_kernel."""
    B, L = sequences.shape
    Lp = _round_up(L, 128)            # lane-dense stores
    Bp = _round_up(B, tb)             # sublane-aligned batch tiles

    seq_p = jnp.zeros((Bp, Lp), jnp.int32).at[:B, :L].set(sequences)
    rand_p = jnp.zeros((Bp, Lp), jnp.uint32).at[:B, :L].set(rand_bits)
    params_p = jnp.zeros((Bp, 8), jnp.int32).at[:B, :].set(params)

    out = pl.pallas_call(
        _aug_kernel,
        out_shape=jax.ShapeDtypeStruct((Bp, Lp), jnp.int32),
        grid=(Bp // tb,),
        in_specs=[
            pl.BlockSpec((tb, Lp), lambda i: (i, 0)),
            pl.BlockSpec((tb, 8), lambda i: (i, 0)),
            pl.BlockSpec((tb, Lp), lambda i: (i, 0)),
        ],
        out_specs=pl.BlockSpec((tb, Lp), lambda i: (i, 0)),
        compiler_params=pltpu.CompilerParams(
            dimension_semantics=("parallel",),
            vmem_limit_bytes=16 << 20,     # tiny tiles; safe on v5e/v6e/v7x
        ),
    )(seq_p, params_p, rand_p)
    return out[:B, :L]


def make_aug_params(seq_lens_host, augment_threshold, rng):
    """Host-side mirror of the module's per-sample `random.choice` dispatch."""
    short_seq_aug_methods = [1, 2]      # mask, reorder
    long_seq_aug_methods = [0, 1, 2]    # crop, mask, reorder
    rows = []
    for sl in seq_lens_host:
        sl = int(sl)
        if sl > augment_threshold:
            m = rng.choice(long_seq_aug_methods)
        else:
            m = rng.choice(short_seq_aug_methods)
        if m == 0:                      # crop
            cl = max(1, int(sl * ETA))
            st = rng.randint(0, max(0, sl - cl))
            rows.append([0, st, cl, sl, 0, 0, 0, 0])
        elif m == 2:                    # reorder
            rl = max(1, int(sl * BETA))
            st = rng.randint(0, max(0, sl - rl))
            rows.append([2, st, rl, sl, 0, 0, 0, 0])
        else:                           # mask
            rows.append([1, 0, 0, sl, 0, 0, 0, 0])
    return jnp.asarray(rows, dtype=jnp.int32)


def random_augmentation(sequences, seq_lens_host, augment_threshold, host_rng, key):
    """Full forward: host dispatch glue + Pallas augmentation kernel.

    Returns (new_seqs, new_seq_lens).  new_seqs keeps the fixed input length L
    (positions past each new length are zero); no device->host sync or
    shape-dependent trim happens per call.
    """
    params = make_aug_params(seq_lens_host, augment_threshold, host_rng)
    sequences = sequences.astype(jnp.int32)
    B, L = sequences.shape
    rand_bits = jax.random.bits(key, (B, L), dtype=jnp.uint32)

    new_seqs = _pallas_augment(sequences, params, rand_bits)

    # new length: crop -> window length; mask / reorder -> unchanged.
    new_seq_lens = jnp.where(params[:, 0] == 0, params[:, 2], params[:, 3])
    # TODO(synk): pad_sequence would also trim trailing all-zero columns to the
    # batch-max new length; left to the consumer to avoid a per-call host sync.
    return new_seqs, new_seq_lens


if __name__ == "__main__":
    B, L = 8, 16
    augment_threshold = 8

    key = jax.random.PRNGKey(0)
    k_len, k_items, k_bits = jax.random.split(key, 3)
    seq_lens = jax.random.randint(k_len, (B,), 3, L + 1).astype(jnp.int32)
    items = jax.random.randint(k_items, (B, L), 1, NUM_ITEMS + 1).astype(jnp.int32)
    # zero-pad positions beyond each sequence's length
    pos = jnp.arange(L, dtype=jnp.int32)[None, :]
    sequences = jnp.where(pos < seq_lens[:, None], items, 0)

    # host-side lengths for the Python-random dispatch (demo-only transfer;
    # in production the lengths are already available on host).
    seq_lens_host = [int(x) for x in jax.device_get(seq_lens)]

    host_rng = pyrandom.Random(0)
    new_seqs, new_seq_lens = random_augmentation(
        sequences, seq_lens_host, augment_threshold, host_rng, k_bits)

    jax.block_until_ready(new_seqs)
    jax.block_until_ready(new_seq_lens)

    assert new_seqs.shape == (B, L)
    assert new_seq_lens.shape == (B,)
    print("KERNEL_OK")
</pallas_src>

<mosaic_0001>
module attributes {stable_mosaic.version = 11 : i64} {
  func.func @_aug_kernel(%arg0: i32, %arg1: memref<8x128xi32, #tpu.memory_space<vmem>>, %arg2: memref<8x8xi32, #tpu.memory_space<vmem>>, %arg3: memref<8x128xi32, #tpu.memory_space<vmem>>, %arg4: memref<8x128xi32, #tpu.memory_space<vmem>>) attributes {dimension_semantics = [#tpu.dimension_semantics<parallel>], iteration_bounds = array<i64: 1>, scalar_prefetch = 0 : i64, scratch_operands = 0 : i64, tpu.core_type = #tpu.core_type<tc>, window_params = [{transform_indices = @transform_0, window_bounds = array<i64: 8, 128>}, {transform_indices = @transform_1, window_bounds = array<i64: 8, 8>}, {transform_indices = @transform_2, window_bounds = array<i64: 8, 128>}, {transform_indices = @transform_3, window_bounds = array<i64: 8, 128>}]} {
    %c0 = arith.constant 0 : index
    %c0_0 = arith.constant 0 : index
    %0 = vector.load %arg1[%c0, %c0_0] : memref<8x128xi32, #tpu.memory_space<vmem>>, vector<8x128xi32>
    %c0_1 = arith.constant 0 : index
    %c0_2 = arith.constant 0 : index
    %1 = vector.load %arg2[%c0_1, %c0_2] : memref<8x8xi32, #tpu.memory_space<vmem>>, vector<8x8xi32>
    %2 = vector.extract_strided_slice %1 {offsets = [0, 0], sizes = [8, 1], strides = [1, 1]} : vector<8x8xi32> to vector<8x1xi32>
    %3 = vector.extract_strided_slice %1 {offsets = [0, 1], sizes = [8, 1], strides = [1, 1]} : vector<8x8xi32> to vector<8x1xi32>
    %4 = vector.extract_strided_slice %1 {offsets = [0, 2], sizes = [8, 1], strides = [1, 1]} : vector<8x8xi32> to vector<8x1xi32>
    %5 = vector.extract_strided_slice %1 {offsets = [0, 3], sizes = [8, 1], strides = [1, 1]} : vector<8x8xi32> to vector<8x1xi32>
    %6 = tpu.iota {dimensions = array<i32: 1>} : vector<8x128xi32>
    %7 = vector.broadcast %3 : vector<8x1xi32> to vector<8x128xi32>
    %8 = arith.addi %7, %6 : vector<8x128xi32>
    %c2_i32 = arith.constant 2 : i32
    %9 = vector.broadcast %c2_i32 : i32 to vector<8x1xi32>
    %10 = arith.muli %9, %3 : vector<8x1xi32>
    %11 = arith.addi %10, %4 : vector<8x1xi32>
    %c1_i32 = arith.constant 1 : i32
    %12 = vector.broadcast %c1_i32 : i32 to vector<8x1xi32>
    %13 = arith.subi %11, %12 : vector<8x1xi32>
    %14 = vector.broadcast %13 : vector<8x1xi32> to vector<8x128xi32>
    %15 = arith.subi %14, %6 : vector<8x128xi32>
    %16 = vector.broadcast %3 : vector<8x1xi32> to vector<8x128xi32>
    %17 = arith.cmpi sge, %6, %16 : vector<8x128xi32>
    %18 = arith.addi %3, %4 : vector<8x1xi32>
    %19 = vector.broadcast %18 : vector<8x1xi32> to vector<8x128xi32>
    %20 = arith.cmpi slt, %6, %19 : vector<8x128xi32>
    %21 = arith.andi %17, %20 : vector<8x128xi1>
    %c0_i32 = arith.constant 0 : i32
    %22 = vector.broadcast %c0_i32 : i32 to vector<8x1xi32>
    %23 = arith.cmpi eq, %2, %22 : vector<8x1xi32>
    %c2_i32_3 = arith.constant 2 : i32
    %24 = vector.broadcast %c2_i32_3 : i32 to vector<8x1xi32>
    %25 = arith.cmpi eq, %2, %24 : vector<8x1xi32>
    %26 = vector.broadcast %25 : vector<8x1xi1> to vector<8x128xi1>
    %27 = arith.andi %26, %21 : vector<8x128xi1>
    %28 = arith.select %27, %15, %6 : vector<8x128xi1>, vector<8x128xi32>
    %29 = vector.shape_cast %23 : vector<8x1xi1> to vector<8x1xi1>
    %30 = vector.broadcast %29 : vector<8x1xi1> to vector<8x128xi1>
    %31 = arith.select %30, %8, %28 : vector<8x128xi1>, vector<8x128xi32>
    %c0_i32_4 = arith.constant 0 : i32
    %c127_i32 = arith.constant 127 : i32
    %32 = vector.broadcast %c0_i32_4 : i32 to vector<8x128xi32>
    %33 = arith.maxsi %32, %31 : vector<8x128xi32>
    %34 = vector.broadcast %c127_i32 : i32 to vector<8x128xi32>
    %35 = arith.minsi %34, %33 : vector<8x128xi32>
    %c0_i32_5 = arith.constant 0 : i32
    %36 = vector.broadcast %c0_i32_5 : i32 to vector<8x128xi32>
    %37 = arith.cmpi slt, %35, %36 : vector<8x128xi32>
    %c128_i32 = arith.constant 128 : i32
    %38 = vector.broadcast %c128_i32 : i32 to vector<8x128xi32>
    %39 = arith.addi %35, %38 : vector<8x128xi32>
    %40 = arith.select %37, %39, %35 : vector<8x128xi1>, vector<8x128xi32>
    %41 = vector.shape_cast %40 : vector<8x128xi32> to vector<8x128x1xi32>
    %42 = vector.shape_cast %41 : vector<8x128x1xi32> to vector<8x128xi32>
    %43 = tpu.dynamic_gather %0[%42] in [1] : vector<8x128xi32>, vector<8x128xi32> -> vector<8x128xi32>
    %c0_6 = arith.constant 0 : index
    %c0_7 = arith.constant 0 : index
    %44 = vector.load %arg3[%c0_6, %c0_7] : memref<8x128xi32, #tpu.memory_space<vmem>>, vector<8x128xi32>
    %c1_i32_8 = arith.constant 1 : i32
    %45 = vector.broadcast %c1_i32_8 : i32 to vector<8x1xi32>
    %46 = arith.cmpi eq, %2, %45 : vector<8x1xi32>
    %c1288490188_i32 = arith.constant 1288490188 : i32
    %47 = vector.broadcast %c1288490188_i32 : i32 to vector<8x128xi32>
    %48 = arith.cmpi ult, %44, %47 : vector<8x128xi32>
    %49 = vector.broadcast %46 : vector<8x1xi1> to vector<8x128xi1>
    %50 = arith.andi %49, %48 : vector<8x128xi1>
    %51 = vector.broadcast %5 : vector<8x1xi32> to vector<8x128xi32>
    %52 = arith.cmpi slt, %6, %51 : vector<8x128xi32>
    %53 = arith.andi %50, %52 : vector<8x128xi1>
    %c101_i32 = arith.constant 101 : i32
    %54 = vector.broadcast %c101_i32 : i32 to vector<8x128xi32>
    %55 = arith.select %53, %54, %43 : vector<8x128xi1>, vector<8x128xi32>
    %c0_i32_9 = arith.constant 0 : i32
    %56 = vector.broadcast %c0_i32_9 : i32 to vector<8x1xi32>
    %57 = arith.cmpi eq, %2, %56 : vector<8x1xi32>
    %58 = arith.select %57, %4, %5 : vector<8x1xi1>, vector<8x1xi32>
    %59 = vector.broadcast %58 : vector<8x1xi32> to vector<8x128xi32>
    %60 = arith.cmpi slt, %6, %59 : vector<8x128xi32>
    %c0_i32_10 = arith.constant 0 : i32
    %61 = vector.broadcast %c0_i32_10 : i32 to vector<8x128xi32>
    %62 = arith.select %60, %55, %61 : vector<8x128xi1>, vector<8x128xi32>
    %c0_11 = arith.constant 0 : index
    %c0_12 = arith.constant 0 : index
    %63 = vector.load %arg4[%c0_11, %c0_12] : memref<8x128xi32, #tpu.memory_space<vmem>>, vector<8x128xi32>
    tpu.vector_store %arg4[%c0_11, %c0_12], %62 {strides = array<i32>} : memref<8x128xi32, #tpu.memory_space<vmem>>, vector<8x128xi32>,
    return
  }
  func.func @transform_0(%arg0: i32) -> (i32, i32) {
    %c0_i32 = arith.constant 0 : i32
    %c0_i32_0 = arith.constant 0 : i32
    return %arg0, %c0_i32 : i32, i32
  }
  func.func @transform_1(%arg0: i32) -> (i32, i32) {
    %c0_i32 = arith.constant 0 : i32
    %c0_i32_0 = arith.constant 0 : i32
    return %arg0, %c0_i32 : i32, i32
  }
  func.func @transform_2(%arg0: i32) -> (i32, i32) {
    %c0_i32 = arith.constant 0 : i32
    %c0_i32_0 = arith.constant 0 : i32
    return %arg0, %c0_i32 : i32, i32
  }
  func.func @transform_3(%arg0: i32) -> (i32, i32) {
    %c0_i32 = arith.constant 0 : i32
    %c0_i32_0 = arith.constant 0 : i32
    return %arg0, %c0_i32 : i32, i32
  }
}

</mosaic_0001>

<bundles_post_ra>
// kernel: tpu_custom_call.1
= control target key start
LH: loop header
LB: loop body
LE: loop exit
PB: predicated region body
PF: predicated region fallthrough
CT: control target
= control target key end

     0   :  { %8 = vsyncpa [#allocation3], 0  ;;  %s334_s0 = inlined_call_operand.hbm [shape: s32[8,128], index: 0, kind: input, shape index: {}]   ;;  %s335_s1 = inlined_call_operand.hbm [shape: s32[8,8], index: 1, kind: input, shape index: {}]   ;;  %s336_s2 = inlined_call_operand.hbm [shape: u32[8,128], index: 2, kind: input, shape index: {}]   ;;  %s337_s3 = inlined_call_operand.hbm [shape: s32[8,128], index: 3, kind: output, shape index: {}]  }
   0x1   :  { %9 = vsyncpa [#allocation6], 0 }
   0x2   :  { %10 = vsyncpa [#allocation4], 0  ;;  %s254_s12 = smov [#allocation5]   ;;  %s255_s14 = smov [#allocation2]  }
   0x3   :  { %s27_s13 = sshll.u32 %s254_s12, 4  ;;  %s17_s15 = sshll.u32 %s255_s14, 4  ;;  %s28_s13 = int_to_ptr.vmem [resolvable:$true] %s27_s13  ;;  %s18_s15 = int_to_ptr.vmem [resolvable:$true] %s17_s15 }
   0x4   :  { %s160_s18 = scalar_lea.hbm %s335_s1, 128 }
   0x5   :  { %p161_p0 = scmp.ne.s32.totalorder %s335_s1, %s160_s18  ;;  %p164_p1 = scmp.lt.u32.totalorder %s160_s18, %s335_s1 }
   0x7   :  { %p166_p2 = pnand %p164_p1, %p161_p0 }
   0x9   :  { %169 = shalt.err (!%p166_p2)
}
   0xa   :  { %s170_s23 = scalar_lea.vmem %s28_s13, 128  ;;  %p175_p4 = scmp.lt.s32.totalorder %s28_s13, %s28_s13 }
   0xb   :  { %p171_p3 = scmp.ne.s32.totalorder %s28_s13, %s170_s23  ;;  %p176_p5 = scmp.lt.s32.totalorder %s170_s23, %s170_s23 }
   0xd   :  { %p177_p6 = por %p176_p5, %p175_p4 }
   0xf   :  { %p178_p7 = pnand %p177_p6, %p171_p3 }
  0x11   :  { %181 = shalt.err (!%p178_p7)
}
  0x12   :  { %30 = dma.hbm_to_vmem [thread:$0]  %s335_s1, 128, %s28_s13, [#allocation6]  }
  0x13   :  { %s182_s28 = scalar_lea.hbm %s334_s0, 128 }
  0x14   :  { %p183_p8 = scmp.ne.s32.totalorder %s334_s0, %s182_s28  ;;  %p186_p9 = scmp.lt.u32.totalorder %s182_s28, %s334_s0 }
  0x16   :  { %p188_p10 = pnand %p186_p9, %p183_p8 }
  0x18   :  { %191 = shalt.err (!%p188_p10)
}
  0x19   :  { %s192_s6 = scalar_lea.vmem %s18_s15, 128  ;;  %p197_p12 = scmp.lt.s32.totalorder %s18_s15, %s18_s15 }
  0x1a   :  { %p193_p11 = scmp.ne.s32.totalorder %s18_s15, %s192_s6  ;;  %p198_p13 = scmp.lt.s32.totalorder %s192_s6, %s192_s6 }
  0x1c   :  { %p199_p0 = por %p198_p13, %p197_p12 }
  0x1e   :  { %p200_p1 = pnand %p199_p0, %p193_p11 }
  0x20   :  { %203 = shalt.err (!%p200_p1)
}
  0x21   :  { %20 = dma.hbm_to_vmem [thread:$0]  %s334_s0, 128, %s18_s15, [#allocation3]  }
  0x22   :  { %s256_s8 = smov [#allocation7]   ;;  %s204_s12 = scalar_lea.hbm %s336_s2, 128 }
  0x23   :  { %s37_s9 = sshll.u32 %s256_s8, 4  ;;  %p205_p2 = scmp.ne.s32.totalorder %s336_s2, %s204_s12  ;;  %s38_s9 = int_to_ptr.vmem [resolvable:$true] %s37_s9 }
  0x24   :  { %p208_p3 = scmp.lt.u32.totalorder %s204_s12, %s336_s2 }
  0x26   :  { %p210_p4 = pnand %p208_p3, %p205_p2 }
  0x28   :  { %213 = shalt.err (!%p210_p4)
}
  0x29   :  { %s214_s18 = scalar_lea.vmem %s38_s9, 128  ;;  %p219_p6 = scmp.lt.s32.totalorder %s38_s9, %s38_s9 }
  0x2a   :  { %p215_p5 = scmp.ne.s32.totalorder %s38_s9, %s214_s18  ;;  %p220_p7 = scmp.lt.s32.totalorder %s214_s18, %s214_s18 }
  0x2c   :  { %p221_p8 = por %p220_p7, %p219_p6 }
  0x2e   :  { %p222_p9 = pnand %p221_p8, %p215_p5 }
  0x30   :  { %225 = shalt.err (!%p222_p9)
}
  0x31   :  { %40 = dma.hbm_to_vmem [thread:$0]  %s336_s2, 128, %s38_s9, [#allocation6]  }
  0x32   :  { %248 = dma.done.wait [#allocation3], 128  }
  0x33   :  { %249 = vsyncadd [#allocation3], 4294967168 }
  0x34   :  { %250 = dma.done.wait [#allocation6], 256  }
  0x35   :  { %251 = vsyncadd [#allocation6], 4294967040  ;;  %v257_v0 = vmov 1   ;;  %v51_v1 = vld [vmem:[#allocation5] sm:$0xff]  ;;  %s258_s19 = smov 127   ;;  %v259_v2 = vmov 0   ;;  %v52_v12 = vlaneseq }
  0x36   :  { %153 = vset.pattern.permute.xlu1 %v257_v0  ;;  %152 = vset.pattern.permute.xlu0 %v257_v0  ;;  %vm74_vm0 = vcmp.eq.s32.totalorder %v51_v1, 0  ;;  %vm100_vm1 = vcmp.eq.s32.totalorder %v51_v1, 1  ;;  %v58_v5 = vmul.u32 2, %v51_v1  ;;  %vm75_vm2 = vcmp.eq.s32.totalorder %v51_v1, 2  ;;  %s260_s2 = smov 126   ;;  %s262_s20 = smov 125  }
  0x37   :  { %59 = vrot.lane.b32.xlu0 %v51_v1, %s258_s19  ;;  %v83_v3 = vsel %vm74_vm0, 1, %v259_v2  ;;  %v102_v4 = vsel %vm100_vm1, 1, %v259_v2  ;;  %v76_v10 = vsel %vm75_vm2, 1, %v259_v2  ;;  %v261_v11 = vmov 3   ;;  %v50_v30 = vld [vmem:[#allocation2] sm:$0xff]  ;;  %v99_v31 = vld [vmem:[#allocation7] sm:$0xff] }
  0x38   :  { %v53_v14 = vand.u32 127, %v52_v12  ;;  %vm101_vm12 = vcmp.lt.u32.totalorder %v99_v31, 1288490188  ;;  %s263_s21 = smov [#allocation8]  }
  0x39   :  { %s131_s22 = sshll.u32 %s263_s21, 4  ;;  %s132_s22 = int_to_ptr.vmem [resolvable:$true] %s131_s22 }
  0x3a   :  { %s226_s23 = scalar_lea.vmem %s132_s22, 128  ;;  %p231_p11 = scmp.lt.s32.totalorder %s132_s22, %s132_s22 }
  0x3b   :  { %55 = vperm.xlu0 %152, %v51_v1   ;;  %p227_p10 = scmp.ne.s32.totalorder %s132_s22, %s226_s23  ;;  %p232_p12 = scmp.lt.s32.totalorder %s226_s23, %s226_s23 }
  0x3d   :  { %p233_p13 = por %p232_p12, %p231_p11 }
  0x3f   :  { %155 = vset.pattern.permute.xlu0 %v259_v2  ;;  %p234_p0 = pnand %p233_p13, %p227_p10 }
  0x40   :  { %85 = vperm.xlu0 %155, %v83_v3  }
  0x44   :  { %104 = vperm.xlu0 %155, %v102_v4  }
  0xa9   :  { %v60_v6 = vpop.permute.xlu0 %59 }
  0xaa   :  { %v61_v7 = vadd.s32 %v60_v6, %v58_v5  ;;  %v68_v8 = vadd.s32 %v60_v6, %v51_v1 }
  0xac   :  { %70 = vperm.xlu1 %153, %v68_v8   ;;  %v141_v9 = vadd.s32 4294967295, %v61_v7 }
  0xb0   :  { %64 = vperm.xlu1 %153, %v141_v9  }
  0xb4   :  { %154 = vset.pattern.permute.xlu1 %v259_v2 }
  0xb5   :  { %78 = vperm.xlu1 %154, %v76_v10  }
  0xb9   :  { %114 = vrot.lane.b32.xlu1 %v51_v1, %s260_s2 }
  0xba   :  { %156 = vset.pattern.permute.xlu1 %v261_v11  ;;  %v56_v15 = vpop.permute.xlu0 %55 }
  0xbb   :  { %vm67_vm4 = vcmp.ge.s32.totalorder %v53_v14, %v56_v15  ;;  %v57_v20 = vadd.s32 %v56_v15, %v53_v14 }
  0xbd   :  { %116 = vrot.lane.b32.xlu1 %v51_v1, %s262_s20 }
  0xbf   :  { %v86_v17 = vpop.permute.xlu0 %85 }
  0xc0   :  { %vm87_vm5 = vcmp.eq.s32.totalorder %v86_v17, 1 }
  0xc1   :  { %109 = vperm.xlu1 %156, %v51_v1  }
  0xc3   :  { %v105_v32 = vpop.permute.xlu0 %104 }
  0xc4   :  { %vm106_vm13 = vcmp.eq.s32.totalorder %v105_v32, 1 }
  0xc5   :  { %158 = vset.pattern.permute.xlu1 %v259_v2  ;;  %vm107_vm15 = vmand %vm106_vm13, %vm101_vm12 }
 0x12b   :  { %v71_v13 = vpop.permute.xlu1 %70 }
 0x12c   :  { %vm72_vm3 = vcmp.lt.s32.totalorder %v53_v14, %v71_v13 }
 0x12d   :  { %vm73_vm6 = vmand %vm67_vm4, %vm72_vm3 }
 0x12f   :  { %v65_v16 = vpop.permute.xlu1 %64 }
 0x130   :  { %v66_v19 = vsub.s32 %v65_v16, %v53_v14 }
 0x134   :  { %v79_v18 = vpop.permute.xlu1 %78 }
 0x135   :  { %vm80_vm7 = vcmp.eq.s32.totalorder %v79_v18, 1 }
 0x136   :  { %vm81_vm8 = vmand %vm80_vm7, %vm73_vm6 }
 0x137   :  { %v82_v21 = vsel %vm81_vm8, %v66_v19, %v53_v14 }
 0x138   :  { %v88_v22 = vsel %vm87_vm5, %v57_v20, %v82_v21  ;;  %v115_v23 = vpop.permute.xlu1 %114 }
 0x139   :  { %vm89_vm9 = vcmp.gt.s32.totalorder %v88_v22, 0 }
 0x13a   :  { %v90_v24 = vsel %vm89_vm9, %v88_v22, 0 }
 0x13b   :  { %vm91_vm10 = vcmp.lt.s32.totalorder %v90_v24, 127 }
 0x13c   :  { %v117_v25 = vpop.permute.xlu1 %116  ;;  %v92_v26 = vsel %vm91_vm10, %v90_v24, 127 }
 0x13d   :  { %vm93_vm11 = vcmp.lt.s32.totalorder %v92_v26, 0  ;;  %v94_v27 = vadd.s32 128, %v92_v26  ;;  %v118_v28 = vsel %vm74_vm0, %v115_v23, %v117_v25 }
 0x13e   :  { %120 = vperm.xlu1 %158, %v118_v28  }
 0x13f   :  { %v95_v29 = vsel %vm93_vm11, %v94_v27, %v92_v26 }
 0x140   :  { %157 = vset.pattern.permute.xlu0 %v95_v29  ;;  %v110_v33 = vpop.permute.xlu1 %109 }
 0x141   :  { %vm111_vm14 = vcmp.lt.s32.totalorder %v53_v14, %v110_v33 }
 0x142   :  { %vm112_vm1 = vmand %vm107_vm15, %vm111_vm14 }
 0x144   :  { %97 = vperm.xlu0 %157, %v50_v30  }
 0x148   :  { %159 = vset.pattern.permute.xlu0 %v259_v2 }
 0x1bd   :  { %v121_v34 = vpop.permute.xlu1 %120 }
 0x1be   :  { %vm122_vm2 = vcmp.lt.s32.totalorder %v53_v14, %v121_v34 }
 0x1c3   :  { %v98_v35 = vpop.permute.xlu0 %97 }
 0x1c4   :  { %v113_v36 = vsel %vm112_vm1, 101, %v98_v35 }
 0x1c5   :  { %v123_v37 = vsel %vm122_vm2, %v113_v36, 0 }
 0x1c6   :  { %124 = vst [vmem:[#allocation8] sm:$0xff] %v123_v37 }
 0x1c7   :  { %237 = shalt.err (!%p234_p0)
}
 0x1c8   :  { %s238_s26 = scalar_lea.hbm %s337_s3, 128 }
 0x1c9   :  { %p239_p1 = scmp.ne.s32.totalorder %s337_s3, %s238_s26  ;;  %p242_p2 = scmp.lt.u32.totalorder %s238_s26, %s337_s3 }
 0x1cb   :  { %p244_p3 = pnand %p242_p2, %p239_p1 }
 0x1cd   :  { %247 = shalt.err (!%p244_p3)
}
 0x1ce   :  { %134 = dma.vmem_to_hbm [thread:$0]  %s132_s22, 128, %s337_s3, [#allocation4]  }
 0x1cf   :  { %252 = dma.done.wait [#allocation4], 128  }
 0x1d0   :  { %253 = vsyncadd [#allocation4], 4294967168 }
 0x1d1   :  { %138 = vsyncpa [#allocation3], 1 }
 0x1d2   :  { %139 = vsyncpa [#allocation6], 1 }
 0x1d3   :  { %140 = vsyncpa [#allocation4], 1 }

</bundles_post_ra>
